<compile_context>
chip_gen: v6e
topology: v6e:2x2x1
jax: 0.10.0
libtpu: 0.0.40
codegen_flags: <defaults>
</compile_context>

<pallas_src>
import functools
import numpy as np

import jax
import jax.numpy as jnp
from jax.experimental import pallas as pl
from jax.experimental.pallas import tpu as pltpu

# ----------------------------- model sizes (small) -----------------------------
H = 32       # real hidden size
V = 32       # real vocab size
S = 8        # source sequence length
B = 2        # batch size
BEAM = 3     # beam size
MAX_LEN = 6
MIN_LEN = 2
ALPHA = 0.6
BOS = 1
EOS = 2

# TPU-friendly padded sizes (lane-dense last dims, sublane-aligned rows).
HP = 128                 # padded hidden (lane axis)
VP = 128                 # padded vocab  (lane axis)
N_ROWS = B * BEAM        # live beam rows (6)
N_PAD = 8                # padded beam rows (f32 sublane multiple)
NEG_PAD = -1e30          # bias on padded vocab columns -> exp underflows to 0

_vmem = functools.partial(pl.BlockSpec, memory_space=pltpu.MemorySpace.VMEM)


# =============================== Pallas kernels ================================

def _encoder_kernel(x_ref, w_ref, b_ref, o_ref):
    # x: [B*S, HP], w: [HP, HP], b: [1, HP]
    h = jnp.dot(x_ref[...], w_ref[...], preferred_element_type=jnp.float32) + b_ref[...]
    o_ref[...] = jnp.tanh(h)


def _decode_step_kernel(tok_ref, cache_ref, src_ref, mask_ref,
                        wqt_ref, wc_ref, bd_ref, wg_ref, bg_ref,
                        logp_ref, newc_ref):
    # tok/cache: [N_PAD, HP], src: [N_PAD, S, HP], mask: [N_PAD, S]
    tok = tok_ref[...]
    cache = cache_ref[...]
    x = tok + 0.1 * cache                                   # decoder input features
    src = src_ref[...]
    mask = mask_ref[...]

    # One K-deep MXU push for both x-consuming projections (wq*1/sqrt(H) || wt).
    qt = jnp.dot(x, wqt_ref[...], preferred_element_type=jnp.float32)    # [N, 2*HP]
    q = qt[:, :HP]                                                       # query
    xt = qt[:, HP:]                                                      # x @ wt

    # Cross-attention.  Batched score / context contractions use VPU multiply +
    # XLU reduce (cheaper than per-row MXU dots at N=8, S=8).  Exact softmax
    # divide (approx reciprocal flagged as a beam-ordering risk).
    scores = jnp.sum(q[:, None, :] * src, axis=-1)                       # [N, S]
    scores = jnp.where(mask > 0, scores, jnp.float32(-1e9))              # finite mask
    scores = scores - jnp.max(scores, axis=-1, keepdims=True)
    p = jnp.exp(scores)
    attn = p / jnp.sum(p, axis=-1, keepdims=True)
    ctx = jnp.sum(attn[:, :, None] * src, axis=1)                        # [N, HP]

    h = jnp.dot(ctx, wc_ref[...], preferred_element_type=jnp.float32) + xt + bd_ref[...]
    dec_out = jnp.tanh(h)                                                # [N, HP]

    # Generator + log-softmax (padded vocab columns carry a -1e30 bias).
    logits = jnp.dot(dec_out, wg_ref[...], preferred_element_type=jnp.float32) + bg_ref[...]
    m = jnp.max(logits, axis=-1, keepdims=True)
    z = logits - m
    lse = jnp.log(jnp.sum(jnp.exp(z), axis=-1, keepdims=True))
    logp_ref[...] = z - lse                                              # [N, VP]

    # Decoder cache update (aliased in place with the cache input).
    newc_ref[...] = cache + tok


# ============================ jitted device wrappers ===========================

@jax.jit
def _encode_fn(src_ids, seg_ids, mask_src, tok_emb, seg_emb, w_enc, b_enc):
    bsz, slen = src_ids.shape
    emb = (jnp.take(tok_emb, src_ids.reshape(-1), axis=0)
           + jnp.take(seg_emb, seg_ids.reshape(-1), axis=0))             # [B*S, HP]
    out = pl.pallas_call(
        _encoder_kernel,
        out_shape=jax.ShapeDtypeStruct((bsz * slen, HP), jnp.float32),
        in_specs=[_vmem()] * 3,
        out_specs=_vmem(),
    )(emb, w_enc, b_enc)
    # src-side masking applied lane-dense in the wrapper (no [*,1] VMEM operand)
    return out.reshape(bsz, slen, HP) * mask_src[..., None]


# Single fused per-step dispatch: reindex + embed + decode (Pallas) + scoring +
# device top-k.  Only the decoder cache is donated (src_feat / src_mask are
# reused unchanged every step and therefore must NOT be donated).
@functools.partial(jax.jit, donate_argnums=(2,))
def _beam_step_fn(idx, fdat, cache, src_feat, src_mask,
                  dec_emb, w_qt, wc, bd, wg, bg):
    sel = idx[0]                        # [N_PAD] beam-reindex of previous step
    last = idx[1]                       # [N_PAD] last token ids (new-row order)
    row_lp = fdat[0]                    # [N_PAD] accumulated beam log-probs
    row_block = fdat[1]                 # [N_PAD] trigram-block flags (0/1)
    inv_len_pen = fdat[2, 0]            # scalar 1/length_penalty
    eos_flag = fdat[2, 1]               # scalar 1.0 iff step < min_length

    cache_sel = jnp.take(cache, sel, axis=0)                             # [N_PAD, HP]
    tok = jnp.take(dec_emb, last, axis=0)                                # [N_PAD, HP]

    logp, new_cache = pl.pallas_call(
        _decode_step_kernel,
        out_shape=(jax.ShapeDtypeStruct((N_PAD, VP), jnp.float32),
                   jax.ShapeDtypeStruct((N_PAD, HP), jnp.float32)),
        in_specs=[_vmem()] * 9,
        out_specs=(_vmem(), _vmem()),
        input_output_aliases={1: 1},     # cache updated in place
    )(tok, cache_sel, src_feat, src_mask, w_qt, wc, bd, wg, bg)

    # ---- on-device beam scoring + per-batch top-k (same dispatch) ----
    lp = logp[:N_ROWS]                                                   # [N_ROWS, VP]
    cols = jax.lax.broadcasted_iota(jnp.int32, (N_ROWS, VP), 1)
    lp = jnp.where((cols == EOS) & (eos_flag > 0.5), jnp.float32(-1e20), lp)
    lp = lp + row_lp[:N_ROWS, None]
    cs = lp * inv_len_pen
    cs = jnp.where(row_block[:N_ROWS, None] > 0.5, jnp.float32(-1e21), cs)
    cs = jnp.where(cols < V, cs, -jnp.inf)                               # kill pad vocab
    cs = cs.reshape(B, BEAM * VP)
    topk_scores, topk_flat = jax.lax.top_k(cs, BEAM)                     # [B, BEAM]
    return topk_scores, topk_flat, new_cache


# ============================ synthetic model pieces ===========================

def _pad2d(x, rows, cols):
    x = np.asarray(x, np.float32)
    out = np.zeros((rows, cols), np.float32)
    out[:x.shape[0], :x.shape[1]] = x
    return out


class SynthModel:
    """Synthetic BERT encoder + single-step decoder + generator with all weights
    zero-padded to lane-dense (128-wide) TPU shapes."""

    def __init__(self, tok_emb, seg_emb, w_enc, b_enc,
                 dec_emb, wq, wc, wt, b_dec, wg, bg):
        self.tok_emb = jnp.asarray(_pad2d(tok_emb, V, HP))
        self.seg_emb = jnp.asarray(_pad2d(seg_emb, 2, HP))
        self.w_enc = jnp.asarray(_pad2d(w_enc, HP, HP))
        self.b_enc = jnp.asarray(_pad2d(b_enc, 1, HP))
        self.dec_emb = jnp.asarray(_pad2d(dec_emb, V, HP))
        # fold the 1/sqrt(H) attention scale into wq and pre-concatenate the two
        # x-consuming projections into a single [HP, 2*HP] weight (one MXU push)
        wq_scaled = np.asarray(wq, np.float32) / np.sqrt(np.float32(H))
        self.w_qt = jnp.asarray(
            np.concatenate([_pad2d(wq_scaled, HP, HP), _pad2d(wt, HP, HP)], axis=1))
        self.wc = jnp.asarray(_pad2d(wc, HP, HP))
        self.b_dec = jnp.asarray(_pad2d(b_dec, 1, HP))
        self.wg = jnp.asarray(_pad2d(wg, HP, VP))
        bg_p = np.full((1, VP), NEG_PAD, np.float32)
        bg_p[0, :V] = np.asarray(bg, np.float32).reshape(-1)[:V]
        self.bg = jnp.asarray(bg_p)
        # attribute parity with the reference model object
        self.bert = self
        self.decoder = self
        self.generator = self

    def encode(self, src, segs, mask_src):
        return _encode_fn(jnp.asarray(src, jnp.int32), jnp.asarray(segs, jnp.int32),
                          jnp.asarray(mask_src, jnp.float32),
                          self.tok_emb, self.seg_emb, self.w_enc, self.b_enc)

    def step(self, idx, fdat, cache, src_feat, src_mask):
        return _beam_step_fn(idx, fdat, cache, src_feat, src_mask,
                             self.dec_emb, self.w_qt, self.wc,
                             self.b_dec, self.wg, self.bg)


class SimpleVocab:
    def __init__(self, size):
        self.ids_to_tokens = {i: "t%d" % i for i in range(size)}


class GlobalScorer:
    def __init__(self, alpha):
        self.alpha = alpha


# ================================= Translator ==================================

class Translator:
    def __init__(self, beam_size, min_length, max_length, model, vocab, symbols,
                 block_trigram=True, global_scorer=None, logger=None, dump_beam=''):
        self.logger = logger
        self.model = model
        self.generator = model.generator
        self.decoder = model.decoder
        self.bert = model.bert
        self.vocab = vocab
        self.symbols = symbols
        self.start_token = symbols['BOS']
        self.end_token = symbols['EOS']
        self.global_scorer = global_scorer
        self.beam_size = beam_size
        self.min_length = min_length
        self.max_length = max_length
        self.block_trigram = block_trigram
        self.dump_beam = dump_beam

    def forward(self, src, segs, mask_src):
        predictions, scores = self._fast_translate_batch(
            src, segs, mask_src, self.max_length, min_length=self.min_length)
        return predictions, scores

    def _fast_translate_batch(self, src, segs, mask_src, max_length, min_length=0):
        beam_size = self.beam_size
        batch_size = int(src.shape[0])
        assert batch_size == B and beam_size == BEAM  # device fast path is specialized
        n_rows = batch_size * beam_size

        # ---- encoder (Pallas) + one-time per-beam tiling of the source state ----
        # Fixed row layout (row r <-> (batch r//beam, beam r%beam)), so src state
        # never needs per-step reindexing; only the decoder cache does.
        src_features = self.model.encode(src, segs, mask_src)             # [B, S, HP]
        src_feat = jnp.repeat(src_features, beam_size, axis=0)            # [B*beam, S, HP]
        src_feat = jnp.pad(src_feat, ((0, N_PAD - n_rows), (0, 0), (0, 0)))
        src_mask = jnp.repeat(jnp.asarray(mask_src, jnp.float32), beam_size, axis=0)
        src_mask = jnp.pad(src_mask, ((0, N_PAD - n_rows), (0, 0)), constant_values=1.0)
        cache = jnp.zeros((N_PAD, HP), jnp.float32)                       # decoder state

        beam_offset = np.arange(0, n_rows, beam_size, dtype=np.int64)     # fixed layout
        alive_batch = np.ones((batch_size,), dtype=bool)
        alive_seq = np.full((n_rows, 1), self.start_token, dtype=np.int64)
        topk_log_probs = np.tile(
            np.array([0.0] + [float('-inf')] * (beam_size - 1), np.float32), batch_size)

        hypotheses = [[] for _ in range(batch_size)]
        results = {'predictions': [[] for _ in range(batch_size)],
                   'scores': [[] for _ in range(batch_size)]}

        sel = np.arange(N_PAD, dtype=np.int32)   # identity reindex for step 0
        alpha = self.global_scorer.alpha

        for step in range(max_length):
            # ---- pack the tiny per-step host -> device payload (2 arrays) ----
            last = np.zeros((N_PAD,), np.int32)
            last[:n_rows] = alive_seq[:, -1]
            idx = np.stack([sel, last]).astype(np.int32)                  # int32[2, N_PAD]

            length_penalty = ((5.0 + (step + 1)) / 6.0) ** alpha

            # per-row trigram-block flag (host, string-based; reference semantics)
            block = np.zeros((N_PAD,), np.float32)
            if self.block_trigram and alive_seq.shape[1] > 3:
                for i in range(n_rows):
                    if not alive_batch[i // beam_size]:
                        continue
                    words = [self.vocab.ids_to_tokens[int(w)] for w in alive_seq[i]]
                    words = ' '.join(words).replace(' ##', '').split()
                    if len(words) <= 3:
                        continue
                    trigrams = [(words[j - 1], words[j], words[j + 1])
                                for j in range(1, len(words) - 1)]
                    if tuple(trigrams[-1]) in trigrams[:-1]:
                        block[i] = 1.0

            fdat = np.zeros((3, N_PAD), np.float32)
            fdat[0, :n_rows] = topk_log_probs
            fdat[0, n_rows:] = float('-inf')
            fdat[1] = block
            fdat[2, 0] = 1.0 / length_penalty
            fdat[2, 1] = 1.0 if step < min_length else 0.0

            # single fused dispatch: reindex + embed + decode + score + top-k
            topk_scores_d, topk_flat_d, cache = self.model.step(
                jnp.asarray(idx), jnp.asarray(fdat), cache, src_feat, src_mask)
            topk_scores = np.asarray(topk_scores_d)                       # [B, beam]
            topk_flat = np.asarray(topk_flat_d)                           # [B, beam]

            topk_log_probs_full = topk_scores * length_penalty
            topk_beam_index = (topk_flat // VP).astype(np.int64)
            topk_ids = (topk_flat % VP).astype(np.int64)

            batch_index = topk_beam_index + beam_offset[:, None]
            select_indices = batch_index.reshape(-1)

            alive_seq = np.concatenate(
                [alive_seq[select_indices], topk_ids.reshape(-1, 1)], axis=-1)

            is_finished = (topk_ids == self.end_token)
            if step + 1 == max_length:
                is_finished[:] = True
            end_condition = is_finished[:, 0]
            if step + 1 == max_length:
                assert bool(end_condition.all())

            if is_finished.any():
                predictions = alive_seq.reshape(-1, beam_size, alive_seq.shape[-1])
                for b in range(batch_size):
                    if not alive_batch[b]:
                        continue
                    if end_condition[b]:
                        is_finished[b, :] = True
                    finished_hyp = np.nonzero(is_finished[b])[0]
                    for j in finished_hyp:
                        hypotheses[b].append((float(topk_scores[b, j]),
                                              predictions[b, j, 1:].copy()))
                    if end_condition[b]:
                        best_hyp = sorted(hypotheses[b], key=lambda x: x[0], reverse=True)
                        score, pred = best_hyp[0]
                        results['scores'][b].append(score)
                        results['predictions'][b].append(pred)
                        alive_batch[b] = False
                if not alive_batch.any():
                    break

            # new-row accumulated log-probs; rows of finished batches stay dead
            topk_log_probs = topk_log_probs_full.reshape(-1).astype(np.float32).copy()
            for b in range(batch_size):
                if not alive_batch[b]:
                    topk_log_probs[b * beam_size:(b + 1) * beam_size] = float('-inf')

            # beam reindex indices for the NEXT step (device cache gather)
            sel = np.zeros((N_PAD,), np.int32)
            sel[:n_rows] = select_indices

        preds_list = []
        for p in results['predictions']:
            seq = p[0].tolist()[0:self.max_length]
            seq = seq + [0] * (self.max_length - len(p[0]))
            preds_list.append(seq)
        predictions = jnp.asarray(preds_list, dtype=jnp.int32)
        scores = jnp.asarray([s[0] for s in results['scores']], dtype=jnp.float32)
        return predictions, scores


# ==================================== main =====================================

if __name__ == "__main__":
    key = jax.random.PRNGKey(0)
    ks = jax.random.split(key, 12)

    # deterministic synthetic parameters (real sizes; padding happens in SynthModel)
    tok_emb = 0.1 * jax.random.normal(ks[0], (V, H), jnp.float32)
    seg_emb = 0.1 * jax.random.normal(ks[1], (2, H), jnp.float32)
    w_enc = 0.1 * jax.random.normal(ks[2], (H, H), jnp.float32)
    b_enc = jnp.zeros((1, H), jnp.float32)
    dec_emb = 0.1 * jax.random.normal(ks[3], (V, H), jnp.float32)
    wq = 0.1 * jax.random.normal(ks[4], (H, H), jnp.float32)
    wc = 0.1 * jax.random.normal(ks[5], (H, H), jnp.float32)
    wt = 0.1 * jax.random.normal(ks[6], (H, H), jnp.float32)
    b_dec = jnp.zeros((1, H), jnp.float32)
    wg = 0.1 * jax.random.normal(ks[7], (H, V), jnp.float32)
    bg = jnp.zeros((1, V), jnp.float32)

    # example inputs
    src = np.asarray(jax.random.randint(ks[8], (B, S), 0, V), dtype=np.int32)
    segs = np.asarray(jax.random.randint(ks[9], (B, S), 0, 2), dtype=np.int32)
    mask_src = np.ones((B, S), np.float32)
    mask_src[1, -2:] = 0.0  # exercise source-side masking

    model = SynthModel(tok_emb, seg_emb, w_enc, b_enc,
                       dec_emb, wq, wc, wt, b_dec, wg, bg)
    translator = Translator(
        beam_size=BEAM, min_length=MIN_LEN, max_length=MAX_LEN,
        model=model, vocab=SimpleVocab(V), symbols={'BOS': BOS, 'EOS': EOS},
        block_trigram=True, global_scorer=GlobalScorer(ALPHA))

    predictions, scores = translator.forward(src, segs, mask_src)
    jax.block_until_ready((predictions, scores))
    assert predictions.shape == (B, MAX_LEN)
    assert scores.shape == (B,)
    print("KERNEL_OK")
</pallas_src>

<mosaic_0001>
module attributes {stable_mosaic.version = 11 : i64} {
  func.func @_encoder_kernel(%arg0: memref<16x128xf32, #tpu.memory_space<vmem>>, %arg1: memref<128x128xf32, #tpu.memory_space<vmem>>, %arg2: memref<1x128xf32, #tpu.memory_space<vmem>>, %arg3: memref<16x128xf32, #tpu.memory_space<vmem>>) attributes {dimension_semantics = [], scalar_prefetch = 0 : i64, scratch_operands = 0 : i64, tpu.core_type = #tpu.core_type<tc>} {
    %c0 = arith.constant 0 : index
    %c0_0 = arith.constant 0 : index
    %0 = vector.load %arg0[%c0, %c0_0] : memref<16x128xf32, #tpu.memory_space<vmem>>, vector<16x128xf32>
    %c0_1 = arith.constant 0 : index
    %c0_2 = arith.constant 0 : index
    %1 = vector.load %arg1[%c0_1, %c0_2] : memref<128x128xf32, #tpu.memory_space<vmem>>, vector<128x128xf32>
    %cst = arith.constant dense<0.000000e+00> : vector<16x128xf32>
    %2 = tpu.matmul %0, %1, %cst {dimension_numbers = #tpu.dot_dimension_numbers<[1], [0], [0], [1], [0, 0, 1, 1], [], []>} : vector<16x128xf32>, vector<128x128xf32>, vector<16x128xf32> -> vector<16x128xf32>
    %c0_3 = arith.constant 0 : index
    %c0_4 = arith.constant 0 : index
    %3 = vector.load %arg2[%c0_3, %c0_4] : memref<1x128xf32, #tpu.memory_space<vmem>>, vector<1x128xf32>
    %4 = vector.broadcast %3 : vector<1x128xf32> to vector<16x128xf32>
    %5 = arith.addf %2, %4 : vector<16x128xf32>
    %6 = math.tanh %5 : vector<16x128xf32>
    %c0_5 = arith.constant 0 : index
    %c0_6 = arith.constant 0 : index
    %7 = vector.load %arg3[%c0_5, %c0_6] : memref<16x128xf32, #tpu.memory_space<vmem>>, vector<16x128xf32>
    tpu.vector_store %arg3[%c0_5, %c0_6], %6 {strides = array<i32>} : memref<16x128xf32, #tpu.memory_space<vmem>>, vector<16x128xf32>,
    return
  }
}

</mosaic_0001>

<bundles_post_ra>
// kernel: _encode_fn.1
= control target key start
LH: loop header
LB: loop body
LE: loop exit
PB: predicated region body
PF: predicated region fallthrough
CT: control target
= control target key end

     0   :  { %s263_s1 = inlined_call_operand.vmem [shape: f32[128,128], index: 1, kind: input, shape index: {}]   ;;  %s264_s0 = inlined_call_operand.vmem [shape: f32[16,128], index: 0, kind: input, shape index: {}]   ;;  %s265_s2 = inlined_call_operand.vmem [shape: f32[1,128], index: 2, kind: input, shape index: {}]   ;;  %s266_s3 = inlined_call_operand.vmem [shape: f32[16,128], index: 3, kind: output, shape index: {}]  }
   0x1   :  { %v31_v0 = vld [vmem:[%s263_s1 + $0x78] sm:$0xff]  ;;  %v30_v1 = vld [vmem:[%s263_s1 + $0x70] sm:$0xff]  ;;  %v29_v2 = vld [vmem:[%s263_s1 + $0x68] sm:$0xff] }
   0x2   :  { %141 = vmatprep.subr.mxu0 %v31_v0  ;;  %v28_v3 = vld [vmem:[%s263_s1 + $0x60] sm:$0xff]  ;;  %v27_v5 = vld [vmem:[%s263_s1 + $0x58] sm:$0xff]  ;;  %v26_v6 = vld [vmem:[%s263_s1 + $0x50] sm:$0xff] }
   0x3   :  { %142 = vmatpush3.msra.mxu0 %v31_v0  ;;  %v14_v4 = vld [vmem:[%s264_s0] sm:$0xff]  ;;  %v25_v7 = vld [vmem:[%s263_s1 + $0x48] sm:$0xff]  ;;  %v23_v9 = vld [vmem:[%s263_s1 + $0x38] sm:$0xff] }
   0x4   :  { %143 = vmatprep.subr.mxu0 %v30_v1  ;;  %173 = vmatprep.mubr.f32.mxu0 %v14_v4  ;;  %v24_v8 = vld [vmem:[%s263_s1 + $0x40] sm:$0xff]  ;;  %v22_v10 = vld [vmem:[%s263_s1 + $0x30] sm:$0xff]  ;;  %v21_v11 = vld [vmem:[%s263_s1 + $0x28] sm:$0xff] }
   0x5   :  { %144 = vmatpush3.msra.mxu0 %v30_v1  ;;  %v20_v12 = vld [vmem:[%s263_s1 + $0x20] sm:$0xff]  ;;  %v19_v13 = vld [vmem:[%s263_s1 + $0x18] sm:$0xff]  ;;  %v18_v14 = vld [vmem:[%s263_s1 + $0x10] sm:$0xff] }
   0x6   :  { %145 = vmatprep.subr.mxu0 %v29_v2  ;;  %v17_v15 = vld [vmem:[%s263_s1 + $0x8] sm:$0xff]  ;;  %v16_v16 = vld [vmem:[%s263_s1] sm:$0xff] }
   0x7   :  { %146 = vmatpush3.msra.mxu0 %v29_v2  ;;  %v15_v17 = vld [vmem:[%s264_s0 + $0x8] sm:$0xff]  ;;  %v122_v18 = vld [vmem:[%s265_s2] ss:$0 sm:$0xff] }
   0x8   :  { %147 = vmatprep.subr.mxu0 %v28_v3 }
   0x9   :  { %148 = vmatpush3.msra.mxu0 %v28_v3 }
   0xa   :  { %149 = vmatprep.subr.mxu0 %v27_v5 }
   0xb   :  { %150 = vmatpush3.msra.mxu0 %v27_v5 }
   0xc   :  { %151 = vmatprep.subr.mxu0 %v26_v6 }
   0xd   :  { %152 = vmatpush3.msra.mxu0 %v26_v6 }
   0xe   :  { %153 = vmatprep.subr.mxu0 %v25_v7 }
   0xf   :  { %154 = vmatpush3.msra.mxu0 %v25_v7 }
  0x10   :  { %155 = vmatprep.subr.mxu0 %v24_v8 }
  0x11   :  { %156 = vmatpush3.msra.mxu0 %v24_v8 }
  0x12   :  { %157 = vmatprep.subr.mxu0 %v23_v9 }
  0x13   :  { %158 = vmatpush3.msra.mxu0 %v23_v9 }
  0x14   :  { %159 = vmatprep.subr.mxu0 %v22_v10 }
  0x15   :  { %160 = vmatpush3.msra.mxu0 %v22_v10 }
  0x16   :  { %161 = vmatprep.subr.mxu0 %v21_v11 }
  0x17   :  { %162 = vmatpush3.msra.mxu0 %v21_v11 }
  0x18   :  { %163 = vmatprep.subr.mxu0 %v20_v12 }
  0x19   :  { %164 = vmatpush3.msra.mxu0 %v20_v12 }
  0x1a   :  { %165 = vmatprep.subr.mxu0 %v19_v13 }
  0x1b   :  { %166 = vmatpush3.msra.mxu0 %v19_v13 }
  0x1c   :  { %167 = vmatprep.subr.mxu0 %v18_v14 }
  0x1d   :  { %168 = vmatpush3.msra.mxu0 %v18_v14 }
  0x1e   :  { %169 = vmatprep.subr.mxu0 %v17_v15 }
  0x1f   :  { %170 = vmatpush3.msra.mxu0 %v17_v15 }
  0x20   :  { %171 = vmatprep.subr.mxu0 %v16_v16 }
  0x21   :  { %172 = vmatpush3.msra.mxu0 %v16_v16 }
  0x22   :  { %174 = vmatmul.mubr.f32.vlgmr.msra.gmra.mxu0 %v15_v17 }
  0xe2   :  { %v175_v19 = vpop.f32.mrf.mxu0 }
  0xe3   :  { %v111_v20 = vadd.f32 %v175_v19, %v122_v18 }
  0xe4   :  { %v105_v21 = vpop.f32.mrf.mxu0 }
  0xe5   :  { %176 = vtanh.f32 %v111_v20  ;;  %v106_v22 = vadd.f32 %v122_v18, %v105_v21 }
  0xe7   :  { %178 = vtanh.f32 %v106_v22 }
  0xf2   :  { %v177_v23 = vpop.eup %176 }
  0xf3   :  { %117 = vst [vmem:[%s266_s3 + $0x8] sm:$0xff] %v177_v23 }
  0xf4   :  { %v179_v24 = vpop.eup %178 }
  0xf5   :  { %116 = vst [vmem:[%s266_s3] sm:$0xff] %v179_v24 }

</bundles_post_ra>
